<compile_context>
chip_gen: v5e
topology: v5e:2x2
jax: 0.10.0
libtpu: 0.0.40
codegen_flags: <defaults>
</compile_context>

<pallas_src>
import jax
import jax.numpy as jnp
import numpy as np
from jax.experimental import pallas as pl
from jax.experimental.pallas import tpu as pltpu


def _ffn_kernel(x_ref, w1_ref, b1_ref, w2_ref, b2_ref, o_ref):
    x = x_ref[...]                                                     # [TM, d_model]
    # First linear + bias + ReLU (norm is identity, dropout unused).
    h = jnp.dot(x, w1_ref[...], preferred_element_type=jnp.float32)   # [TM, d_ff]
    h = jnp.maximum(h + b1_ref[...], 0.0).astype(w2_ref.dtype)
    # Second linear + bias.
    y = jnp.dot(h, w2_ref[...], preferred_element_type=jnp.float32)   # [TM, d_model]
    o_ref[...] = (y + b2_ref[...]).astype(o_ref.dtype)


def _pick_row_tile(m, d_model, d_ff, itemsize):
    """Largest row tile that divides m and keeps per-tile activations modest."""
    # Per-row bytes held live in VMEM: x tile + f32 hidden + output tile
    # (double buffering of x/out handled by the 2x factor).
    per_row = 2 * d_model * itemsize * 2 + d_ff * 4
    budget = 12 * 1024 * 1024  # conservative activation budget (bytes)
    for cand in (1024, 512, 256, 128, 64, 32, 16, 8):
        if m % cand == 0 and cand * per_row <= budget:
            return cand
    return m  # tiny / unaligned fallback: one tile spanning all rows


def positionwise_feed_forward(x, w1, b1, w2, b2, *, row_tile=None):
    """y = relu(x @ w1.T + b1) @ w2.T + b2  (weights in PyTorch nn.Linear [out, in] layout)."""
    B, N, d_model = x.shape
    d_ff = w1.shape[0]
    assert w1.shape == (d_ff, d_model)
    assert w2.shape == (d_model, d_ff)

    # Flatten batch x sequence into one row dimension (free on contiguous data).
    M = B * N
    x2 = x.reshape(M, d_model)

    # One-time transposes OUTSIDE the kernel so the MXU sees plain [M,K]x[K,N].
    w1_t = jnp.asarray(w1, x.dtype).T                    # [d_model, d_ff]
    w2_t = jnp.asarray(w2, x.dtype).T                    # [d_ff, d_model]
    b1_r = jnp.asarray(b1, jnp.float32).reshape(1, d_ff)
    b2_r = jnp.asarray(b2, jnp.float32).reshape(1, d_model)

    tm = row_tile if row_tile is not None else _pick_row_tile(
        M, d_model, d_ff, jnp.dtype(x.dtype).itemsize)
    assert M % tm == 0, "row tile must divide batch*seq"
    grid = (M // tm,)

    out = pl.pallas_call(
        _ffn_kernel,
        out_shape=jax.ShapeDtypeStruct((M, d_model), x.dtype),
        grid=grid,
        in_specs=[
            pl.BlockSpec((tm, d_model), lambda i: (i, 0)),       # x tile (streamed)
            pl.BlockSpec((d_model, d_ff), lambda i: (0, 0)),     # W1^T (resident)
            pl.BlockSpec((1, d_ff), lambda i: (0, 0)),           # b1   (resident)
            pl.BlockSpec((d_ff, d_model), lambda i: (0, 0)),     # W2^T (resident)
            pl.BlockSpec((1, d_model), lambda i: (0, 0)),        # b2   (resident)
        ],
        out_specs=pl.BlockSpec((tm, d_model), lambda i: (i, 0)),
        compiler_params=pltpu.CompilerParams(
            dimension_semantics=("parallel",)),
    )(x2, w1_t, b1_r, w2_t, b2_r)

    return out.reshape(B, N, d_model)


if __name__ == "__main__":
    # Small shapes consistent with the module: batch=2, seq=16, d_model=32, d_ff=64.
    B, N, d_model, d_ff = 2, 16, 32, 64

    key = jax.random.PRNGKey(0)
    kx, kw1, kb1, kw2, kb2 = jax.random.split(key, 5)

    x = jax.random.normal(kx, (B, N, d_model), dtype=jnp.float32)
    bound1 = 1.0 / float(np.sqrt(d_model))
    bound2 = 1.0 / float(np.sqrt(d_ff))
    w1 = jax.random.uniform(kw1, (d_ff, d_model), jnp.float32, -bound1, bound1)
    b1 = jax.random.uniform(kb1, (d_ff,), jnp.float32, -bound1, bound1)
    w2 = jax.random.uniform(kw2, (d_model, d_ff), jnp.float32, -bound2, bound2)
    b2 = jax.random.uniform(kb2, (d_model,), jnp.float32, -bound2, bound2)

    y = positionwise_feed_forward(x, w1, b1, w2, b2)
    y = jax.block_until_ready(y)

    # Pure-JAX reference (same math as the PyTorch forward).
    ref = jnp.maximum(jnp.einsum("bnd,fd->bnf", x, w1) + b1, 0.0)
    ref = jnp.einsum("bnf,df->bnd", ref, w2) + b2

    assert y.shape == (B, N, d_model)
    assert np.allclose(np.asarray(y), np.asarray(ref), atol=1e-4, rtol=1e-4)
    print("KERNEL_OK")
</pallas_src>

<mosaic_0001>
module attributes {stable_mosaic.version = 11 : i64} {
  func.func @_ffn_kernel(%arg0: i32, %arg1: memref<32x32xf32, #tpu.memory_space<vmem>>, %arg2: memref<32x64xf32, #tpu.memory_space<vmem>>, %arg3: memref<1x64xf32, #tpu.memory_space<vmem>>, %arg4: memref<64x32xf32, #tpu.memory_space<vmem>>, %arg5: memref<1x32xf32, #tpu.memory_space<vmem>>, %arg6: memref<32x32xf32, #tpu.memory_space<vmem>>) attributes {dimension_semantics = [#tpu.dimension_semantics<parallel>], iteration_bounds = array<i64: 1>, scalar_prefetch = 0 : i64, scratch_operands = 0 : i64, tpu.core_type = #tpu.core_type<tc>, window_params = [{transform_indices = @transform_0, window_bounds = array<i64: 32, 32>}, {pipeline_mode = #tpu.pipeline_mode<synchronous>, transform_indices = @transform_1, window_bounds = array<i64: 32, 64>}, {pipeline_mode = #tpu.pipeline_mode<synchronous>, transform_indices = @transform_2, window_bounds = array<i64: 1, 64>}, {pipeline_mode = #tpu.pipeline_mode<synchronous>, transform_indices = @transform_3, window_bounds = array<i64: 64, 32>}, {pipeline_mode = #tpu.pipeline_mode<synchronous>, transform_indices = @transform_4, window_bounds = array<i64: 1, 32>}, {transform_indices = @transform_5, window_bounds = array<i64: 32, 32>}]} {
    %c0 = arith.constant 0 : index
    %c0_0 = arith.constant 0 : index
    %0 = vector.load %arg1[%c0, %c0_0] : memref<32x32xf32, #tpu.memory_space<vmem>>, vector<32x32xf32>
    %c0_1 = arith.constant 0 : index
    %c0_2 = arith.constant 0 : index
    %1 = vector.load %arg2[%c0_1, %c0_2] : memref<32x64xf32, #tpu.memory_space<vmem>>, vector<32x64xf32>
    %cst = arith.constant dense<0.000000e+00> : vector<32x64xf32>
    %2 = tpu.matmul %0, %1, %cst {dimension_numbers = #tpu.dot_dimension_numbers<[1], [0], [0], [1], [0, 0, 1, 1], [], []>} : vector<32x32xf32>, vector<32x64xf32>, vector<32x64xf32> -> vector<32x64xf32>
    %c0_3 = arith.constant 0 : index
    %c0_4 = arith.constant 0 : index
    %3 = vector.load %arg3[%c0_3, %c0_4] : memref<1x64xf32, #tpu.memory_space<vmem>>, vector<1x64xf32>
    %4 = vector.broadcast %3 : vector<1x64xf32> to vector<32x64xf32>
    %5 = arith.addf %2, %4 : vector<32x64xf32>
    %cst_5 = arith.constant 0.000000e+00 : f32
    %6 = vector.broadcast %cst_5 : f32 to vector<32x64xf32>
    %7 = arith.maximumf %5, %6 : vector<32x64xf32>
    %c0_6 = arith.constant 0 : index
    %c0_7 = arith.constant 0 : index
    %8 = vector.load %arg4[%c0_6, %c0_7] : memref<64x32xf32, #tpu.memory_space<vmem>>, vector<64x32xf32>
    %cst_8 = arith.constant dense<0.000000e+00> : vector<32x32xf32>
    %9 = tpu.matmul %7, %8, %cst_8 {dimension_numbers = #tpu.dot_dimension_numbers<[1], [0], [0], [1], [0, 0, 1, 1], [], []>} : vector<32x64xf32>, vector<64x32xf32>, vector<32x32xf32> -> vector<32x32xf32>
    %c0_9 = arith.constant 0 : index
    %c0_10 = arith.constant 0 : index
    %10 = vector.load %arg5[%c0_9, %c0_10] : memref<1x32xf32, #tpu.memory_space<vmem>>, vector<1x32xf32>
    %11 = vector.broadcast %10 : vector<1x32xf32> to vector<32x32xf32>
    %12 = arith.addf %9, %11 : vector<32x32xf32>
    %c0_11 = arith.constant 0 : index
    %c0_12 = arith.constant 0 : index
    %13 = vector.load %arg6[%c0_11, %c0_12] : memref<32x32xf32, #tpu.memory_space<vmem>>, vector<32x32xf32>
    tpu.vector_store %arg6[%c0_11, %c0_12], %12 {strides = array<i32>} : memref<32x32xf32, #tpu.memory_space<vmem>>, vector<32x32xf32>,
    return
  }
  func.func @transform_0(%arg0: i32) -> (i32, i32) {
    %c0_i32 = arith.constant 0 : i32
    %c0_i32_0 = arith.constant 0 : i32
    return %arg0, %c0_i32 : i32, i32
  }
  func.func @transform_1(%arg0: i32) -> (i32, i32) {
    %c0_i32 = arith.constant 0 : i32
    %c0_i32_0 = arith.constant 0 : i32
    %c0_i32_1 = arith.constant 0 : i32
    return %c0_i32, %c0_i32_0 : i32, i32
  }
  func.func @transform_2(%arg0: i32) -> (i32, i32) {
    %c0_i32 = arith.constant 0 : i32
    %c0_i32_0 = arith.constant 0 : i32
    %c0_i32_1 = arith.constant 0 : i32
    return %c0_i32, %c0_i32_0 : i32, i32
  }
  func.func @transform_3(%arg0: i32) -> (i32, i32) {
    %c0_i32 = arith.constant 0 : i32
    %c0_i32_0 = arith.constant 0 : i32
    %c0_i32_1 = arith.constant 0 : i32
    return %c0_i32, %c0_i32_0 : i32, i32
  }
  func.func @transform_4(%arg0: i32) -> (i32, i32) {
    %c0_i32 = arith.constant 0 : i32
    %c0_i32_0 = arith.constant 0 : i32
    %c0_i32_1 = arith.constant 0 : i32
    return %c0_i32, %c0_i32_0 : i32, i32
  }
  func.func @transform_5(%arg0: i32) -> (i32, i32) {
    %c0_i32 = arith.constant 0 : i32
    %c0_i32_0 = arith.constant 0 : i32
    return %arg0, %c0_i32 : i32, i32
  }
}

</mosaic_0001>

<bundles_post_ra>
// kernel: tpu_custom_call.1
= control target key start
LH: loop header
LB: loop body
LE: loop exit
PB: predicated region body
PF: predicated region fallthrough
CT: control target
= control target key end

     0   :  { %vm33_vm0 = vcmask 261120   ;;  %s304_s0 = inlined_call_operand.vmem [shape: f32[32,32], index: 0, kind: input, shape index: {}]   ;;  %s305_s1 = inlined_call_operand.vmem [shape: f32[32,64], index: 1, kind: input, shape index: {}]   ;;  %s306_s2 = inlined_call_operand.vmem [shape: f32[1,64], index: 2, kind: input, shape index: {}]   ;;  %s307_s3 = inlined_call_operand.vmem [shape: f32[64,32], index: 3, kind: input, shape index: {}]   ;;  %s308_s4 = inlined_call_operand.vmem [shape: f32[1,32], index: 4, kind: input, shape index: {}]   ;;  %s309_s5 = inlined_call_operand.hbm [shape: f32[32,32], index: 5, kind: output, shape index: {}]  }
   0x1   :  { %v28_v0 = vld [vmem:[%s305_s1 + $0x18] sm:$0xff]  ;;  %v27_v1 = vld [vmem:[%s305_s1 + $0x10] sm:$0xff]  ;;  %v26_v2 = vld [vmem:[%s305_s1 + $0x8] sm:$0xff] }
   0x2   :  { %58 = vmatpush.msra.mxu0 %v28_v0  ;;  %163 = vmatpush.msra.mxu3 %v28_v0  ;;  %v86_v3 = vld [vmem:[%s307_s3 + $0x38] sm:$0xff]  ;;  %v85_v4 = vld [vmem:[%s307_s3 + $0x30] sm:$0xff]  ;;  %v25_v5 = vld [vmem:[%s305_s1] sm:$0xff] }
   0x3   :  { %v21_v6 = vld [vmem:[%s304_s0] sm:$0xff]  ;;  %112 = vmatpush.msra.mxu1 %v86_v3  ;;  %167 = vmatpush.msra.mxu2 %v86_v3  ;;  %v22_v7 = vld [vmem:[%s304_s0 + $0x8] sm:$0xff] }
   0x4   :  { %59 = vmatpush.msra.mxu0 %v27_v1  ;;  %164 = vmatpush.msra.mxu3 %v27_v1 }
   0x6   :  { %60 = vmatpush.msra.mxu0 %v26_v2  ;;  %165 = vmatpush.msra.mxu3 %v26_v2 }
   0x7   :  { %10 = vsyncpa [#allocation3], 0  ;;  %113 = vmatpush.msra.mxu1 %v85_v4  ;;  %v84_v8 = vld [vmem:[%s307_s3 + $0x28] sm:$0xff]  ;;  %168 = vmatpush.msra.mxu2 %v85_v4  ;;  %v83_v9 = vld [vmem:[%s307_s3 + $0x20] sm:$0xff]  ;;  %vm91_vm1 = vcmask 523264   ;;  %s143_s29 = sshll.u32 %s309_s5, 4  ;;  %s144_s29 = int_to_ptr.hbm [resolvable:$true] %s143_s29 }
   0x8   :  { %61 = vmatpush.msra.mxu0 %v25_v5  ;;  %166 = vmatpush.msra.mxu3 %v25_v5  ;;  %v82_v10 = vld [vmem:[%s307_s3 + $0x18] sm:$0xff]  ;;  %v23_v11 = vld [vmem:[%s304_s0 + $0x10] sm:$0xff]  ;;  %v80_v14 = vld [vmem:[%s307_s3 + $0x8] sm:$0xff]  ;;  %s208_s30 = smov 8  }
   0x9   :  { %155 = vmatmul.msk.f32.vlgmr.msra.gmra.mxu0 %vm33_vm0, %v21_v6  ;;  %156 = vmatmul.msk.f32.vlgmr.msra.gmra.mxu3 %vm33_vm0, %v22_v7  ;;  %v24_v12 = vld [vmem:[%s304_s0 + $0x18] sm:$0xff]  ;;  %v81_v13 = vld [vmem:[%s307_s3 + $0x10] sm:$0xff]  ;;  %v79_v15 = vld [vmem:[%s307_s3] sm:$0xff] }
   0xa   :  { %114 = vmatpush.msra.mxu1 %v84_v8  ;;  %169 = vmatpush.msra.mxu2 %v84_v8  ;;  %v178_v16 = vld [vmem:[%s306_s2] ss:$0 sm:$0xff]  ;;  %s206_s2 = smov [#allocation2]  }
   0xb   :  { %v179_v29 = vld [vmem:[%s308_s4] ss:$0 sm:$0xff]  ;;  %s141_s26 = sshll.u32 %s206_s2, 4  ;;  %s207_s4 = smov 128   ;;  %s142_s26 = int_to_ptr.vmem [resolvable:$true] %s141_s26 }
   0xc   :  { %115 = vmatpush.msra.mxu1 %v83_v9  ;;  %170 = vmatpush.msra.mxu2 %v83_v9 }
   0xe   :  { %116 = vmatpush.msra.mxu1 %v82_v10  ;;  %171 = vmatpush.msra.mxu2 %v82_v10 }
  0x10   :  { %117 = vmatpush.msra.mxu1 %v81_v13  ;;  %172 = vmatpush.msra.mxu2 %v81_v13 }
  0x11   :  { %157 = vmatmul.msk.f32.gmra.mxu3 %vm33_vm0, %v23_v11 }
  0x12   :  { %118 = vmatpush.msra.mxu1 %v80_v14  ;;  %173 = vmatpush.msra.mxu2 %v80_v14 }
  0x14   :  { %119 = vmatpush.msra.mxu1 %v79_v15  ;;  %174 = vmatpush.msra.mxu2 %v79_v15 }
  0x19   :  { %158 = vmatmul.msk.f32.gmra.mxu3 %vm33_vm0, %v24_v12 }
  0x86   :  { %v63_v17 = vpop.f32.mrf.mxu0 }
  0x87   :  { %v64_v18 = vadd.f32 %v178_v16, %v63_v17 }
  0x89   :  { %v75_v19 = vmax.f32 %v64_v18, 0.0 }
  0x8b   :  { %159 = vmatmul.msk.f32.vlgmr.msra.gmra.mxu1 %vm91_vm1, %v75_v19 }
  0x8c   :  { %v66_v20 = vpop.f32.mrf.mxu3 }
  0x8d   :  { %v67_v21 = vadd.f32 %v178_v16, %v66_v20 }
  0x8f   :  { %v76_v22 = vmax.f32 %v67_v21, 0.0 }
  0x93   :  { %160 = vmatmul.msk.f32.gmra.mxu1 %vm91_vm1, %v76_v22 }
  0x94   :  { %v69_v23 = vpop.f32.mrf.mxu3 }
  0x95   :  { %v70_v24 = vadd.f32 %v178_v16, %v69_v23 }
  0x97   :  { %v77_v25 = vmax.f32 %v70_v24, 0.0 }
  0x99   :  { %161 = vmatmul.msk.f32.vlgmr.msra.gmra.mxu2 %vm91_vm1, %v77_v25 }
  0x9c   :  { %v72_v26 = vpop.f32.mrf.mxu3 }
  0x9d   :  { %v73_v27 = vadd.f32 %v178_v16, %v72_v26 }
  0x9f   :  { %v78_v28 = vmax.f32 %v73_v27, 0.0 }
  0xa1   :  { %162 = vmatmul.msk.f32.gmra.mxu2 %vm91_vm1, %v78_v28 }
 0x108   :  { %v121_v30 = vpop.f32.mrf.mxu1 }
 0x109   :  { %v122_v31 = vadd.f32 %v179_v29, %v121_v30 }
 0x10b   :  { %133 = vst.msk [vmem:[#allocation2] sm:$0xff] %vm33_vm0, %v122_v31 }
 0x110   :  { %v124_v32 = vpop.f32.mrf.mxu1 }
 0x111   :  { %v125_v33 = vadd.f32 %v179_v29, %v124_v32 }
 0x113   :  { %134 = vst.msk [vmem:[#allocation2 + $0x8] sm:$0xff] %vm33_vm0, %v125_v33 }
 0x11c   :  { %v127_v34 = vpop.f32.mrf.mxu2 }
 0x11d   :  { %v128_v35 = vadd.f32 %v179_v29, %v127_v34 }
 0x11f   :  { %135 = vst.msk [vmem:[#allocation2 + $0x10] sm:$0xff] %vm33_vm0, %v128_v35 }
 0x124   :  { %v130_v36 = vpop.f32.mrf.mxu2 }
 0x125   :  { %v131_v37 = vadd.f32 %v179_v29, %v130_v36 }
 0x127   :  { %136 = vst.msk [vmem:[#allocation2 + $0x18] sm:$0xff] %vm33_vm0, %v131_v37 }
 0x128   :  { %149 = dma.vmem_to_hbm [thread:$0]  %s142_s26, 512, %s144_s29, [#allocation3], %s207_s4, %s207_s4, %s208_s30  }
 0x129   :  { %204 = dma.done.wait [#allocation3], 512  }
 0x12a   :  { %205 = vsyncadd [#allocation3], 4294966784 }
 0x12b   :  { %154 = vsyncpa [#allocation3], 1 }

</bundles_post_ra>
